<compile_context>
chip_gen: v5e
topology: v5e:2x2
jax: 0.10.0
libtpu: 0.0.40
codegen_flags: <defaults>
</compile_context>

<pallas_src>
import functools
import math

import jax
import jax.numpy as jnp
from jax.experimental import pallas as pl
from jax.experimental.pallas import tpu as pltpu

NEG_BIG = -1.0e12
LANE_PAD = 128  # lane-dense output width


def _gat_fused_kernel(x_ref, bias_ref, w1_ref, ab1_ref, w2_ref, a2_ref, pad_ref,
                      out_ref, *, alpha, batch, n_nodes, n_heads, hid_c, out_c):
    n = n_nodes
    bias = bias_ref[...]        # (N, N) additive mask: 0 where (adj+I)>0 else -1e12
    w2 = w2_ref[...]            # (n_heads*hid, out_c)
    a2 = a2_ref[...]            # (out_c, 2)  columns = [a_src | a_dst] of layer 2
    pad_proj = pad_ref[...]     # (out_c, LANE_PAD) identity pad projector

    # Layer-1 projection for all batch elements and all heads in one matmul.
    h_all = jnp.dot(x_ref[...], w1_ref[...],
                    preferred_element_type=jnp.float32)          # (B*N, n_heads*hid)
    # Fused (block-diagonal) attention-vector projection for all heads at once.
    ea_all = jnp.dot(h_all, ab1_ref[...],
                     preferred_element_type=jnp.float32)         # (B*N, 2*n_heads)

    def attention(e_src, e_dst, h):
        # e[i, j] = LeakyReLU(e_src[i] + e_dst[j]); mask; softmax over j; att @ h
        e = e_src + e_dst.T                                      # (N, N)
        e = jnp.where(e > 0, e, alpha * e)                       # LeakyReLU(alpha)
        att = e + bias                                           # additive adjacency mask
        m = jnp.max(att, axis=-1, keepdims=True)
        p = jnp.exp(att - m)
        denom = jnp.sum(p, axis=-1, keepdims=True)
        att = p * pl.reciprocal(denom, approx=True)              # EUP, off the VALU slot
        return jnp.dot(att, h, preferred_element_type=jnp.float32)

    # TODO(synk): for large N, tile the j axis with online softmax (flash style,
    # grid axis marked "arbitrary", m/l/acc in VMEM scratch) and feed bf16 inputs
    # to the MXU matmuls on v6e/v7x; at N=16 the dense f32 form is optimal.
    for b in range(batch):                                       # B is tiny & static
        hb = h_all[b * n:(b + 1) * n, :]                         # (N, n_heads*hid)
        eab = ea_all[b * n:(b + 1) * n, :]                       # (N, 2*n_heads)

        # ReLU(concat_h(head_h)) @ W2 == sum_h ReLU(head_h) @ W2[h*hid:(h+1)*hid]
        h2 = jnp.zeros((n, out_c), jnp.float32)
        for hd in range(n_heads):
            o1 = attention(eab[:, 2 * hd:2 * hd + 1],
                           eab[:, 2 * hd + 1:2 * hd + 2],
                           hb[:, hd * hid_c:(hd + 1) * hid_c])
            o1 = jnp.maximum(o1, 0.0)                            # fused head ReLU
            h2 = h2 + jnp.dot(o1, w2[hd * hid_c:(hd + 1) * hid_c, :],
                              preferred_element_type=jnp.float32)

        # Layer 2 attention on h2.
        ea2 = jnp.dot(h2, a2, preferred_element_type=jnp.float32)   # (N, 2)
        o2 = attention(ea2[:, 0:1], ea2[:, 1:2], h2)                 # (N, out_c)
        o2 = jnp.maximum(o2, 0.0)                                    # final ReLU

        # Lane-dense store: (N, out_c) -> (N, LANE_PAD) via identity pad matmul.
        out_ref[b * n:(b + 1) * n, :] = jnp.dot(
            o2, pad_proj, preferred_element_type=jnp.float32).astype(out_ref.dtype)


def gat_forward(x, adj, params, *, alpha=0.2):
    """Fused forward pass of the 2-head GAT + second GraphAttentionLayer."""
    B, N = x.shape[0], x.shape[1]
    x = x.reshape(B, N, -1).astype(jnp.float32)
    C_in = x.shape[-1]

    heads = params["heads"]
    n_heads = len(heads)
    hid_c = heads[0][0].shape[1]
    W2, a2 = params["conv2"]
    out_c = W2.shape[1]
    H = n_heads * hid_c

    # ---- one-time parameter layout plumbing (wrapper side) ----
    # Stacked head weights: (C_in, n_heads*hid).
    w1 = jnp.concatenate([W for (W, _) in heads], axis=1).astype(jnp.float32)
    # Block-diagonal attention vectors: column 2h = a_src of head h, 2h+1 = a_dst.
    ab1 = jnp.zeros((H, 2 * n_heads), jnp.float32)
    for h, (_, a) in enumerate(heads):
        ab1 = ab1.at[h * hid_c:(h + 1) * hid_c, 2 * h].set(a[:hid_c, 0])
        ab1 = ab1.at[h * hid_c:(h + 1) * hid_c, 2 * h + 1].set(a[hid_c:, 0])
    a2m = jnp.concatenate([a2[:out_c, :], a2[out_c:, :]], axis=1)   # (out_c, 2)

    # Additive attention mask built from (adj + I) > 0 (preserves self-loops).
    adj_sl = adj.astype(jnp.float32) + jnp.eye(N, dtype=jnp.float32)
    bias = jnp.where(adj_sl > 0, 0.0, NEG_BIG).astype(jnp.float32)  # (N, N)

    # Identity pad projector so the kernel output slab is lane-dense (128 lanes).
    pad_proj = jnp.eye(out_c, LANE_PAD, dtype=jnp.float32)

    x2d = x.reshape(B * N, C_in)

    kernel = functools.partial(
        _gat_fused_kernel, alpha=alpha, batch=B, n_nodes=N,
        n_heads=n_heads, hid_c=hid_c, out_c=out_c)

    out_pad = pl.pallas_call(
        kernel,
        out_shape=jax.ShapeDtypeStruct((B * N, LANE_PAD), jnp.float32),
        grid=(1,),   # whole problem (all batch, all heads, both layers) in one step
        in_specs=[
            pl.BlockSpec((B * N, C_in), lambda i: (0, 0)),
            pl.BlockSpec((N, N), lambda i: (0, 0)),
            pl.BlockSpec((C_in, H), lambda i: (0, 0)),
            pl.BlockSpec((H, 2 * n_heads), lambda i: (0, 0)),
            pl.BlockSpec((H, out_c), lambda i: (0, 0)),
            pl.BlockSpec((out_c, 2), lambda i: (0, 0)),
            pl.BlockSpec((out_c, LANE_PAD), lambda i: (0, 0)),
        ],
        out_specs=pl.BlockSpec((B * N, LANE_PAD), lambda i: (0, 0)),
        compiler_params=pltpu.CompilerParams(dimension_semantics=("arbitrary",)),
    )(x2d, bias, w1, ab1, W2.astype(jnp.float32), a2m, pad_proj)

    out = out_pad[:, :out_c].reshape(B, N, out_c)
    # torch.squeeze(output_2.unsqueeze(2)) removes all size-1 dims.
    return jnp.squeeze(out[:, :, None, :])


# ---------------- parameter init (matches torch xavier_uniform_, gain=1.414) ----------------
def xavier_uniform(key, shape, gain=1.414):
    fan_in, fan_out = shape[0], shape[1]
    bound = gain * math.sqrt(6.0 / (fan_in + fan_out))
    return jax.random.uniform(key, shape, jnp.float32, minval=-bound, maxval=bound)


def init_gat_params(key, in_c, hid_c, out_c, n_heads=2):
    keys = jax.random.split(key, 2 * n_heads + 2)
    heads = []
    for h in range(n_heads):
        W = xavier_uniform(keys[2 * h], (in_c, hid_c))
        a = xavier_uniform(keys[2 * h + 1], (2 * hid_c, 1))
        heads.append((W, a))
    W2 = xavier_uniform(keys[-2], (hid_c * n_heads, out_c))
    a2 = xavier_uniform(keys[-1], (2 * out_c, 1))
    return {"heads": heads, "conv2": (W2, a2)}


# ---------------- pure-JAX reference (mirrors the torch module) ----------------
def _gat_layer_reference(features, adj, W, a, alpha):
    N = features.shape[1]
    C = W.shape[1]
    adj_sl = adj + jnp.eye(N, dtype=adj.dtype)
    h = features @ W                                   # (B, N, C)
    src = h @ a[:C]                                    # (B, N, 1)
    dst = h @ a[C:]                                    # (B, N, 1)
    e = src + jnp.swapaxes(dst, 1, 2)                  # (B, N, N)
    e = jnp.where(e > 0, e, alpha * e)                 # LeakyReLU
    att = jnp.where(adj_sl[None] > 0, e, jnp.full_like(e, NEG_BIG))
    att = jax.nn.softmax(att, axis=-1)
    return att @ h


def _gat_forward_reference(x, adj, params, alpha=0.2):
    outs = [jax.nn.relu(_gat_layer_reference(x, adj, W, a, alpha))
            for (W, a) in params["heads"]]
    z = jnp.concatenate(outs, axis=-1)
    W2, a2 = params["conv2"]
    out2 = jax.nn.relu(_gat_layer_reference(z, adj, W2, a2, alpha))
    return jnp.squeeze(out2[:, :, None, :])


if __name__ == "__main__":
    B, N = 2, 16
    in_c, hid_c, out_c, n_heads = 4, 8, 4, 2

    key = jax.random.PRNGKey(0)
    k_x, k_adj, k_p = jax.random.split(key, 3)

    x = jax.random.normal(k_x, (B, N, in_c), dtype=jnp.float32)
    adj = (jax.random.uniform(k_adj, (N, N)) > 0.6).astype(jnp.float32)
    params = init_gat_params(k_p, in_c, hid_c, out_c, n_heads)

    out = jax.jit(gat_forward)(x, adj, params)
    jax.block_until_ready(out)
    assert out.shape == (B, N, out_c), out.shape

    # Correctness check against the pure-JAX reference (generous tolerance:
    # approximate EUP reciprocal in the softmax normalization).
    ref = _gat_forward_reference(x, adj, params)
    err = float(jnp.max(jnp.abs(out - ref)))
    assert err < 5e-2, f"max abs error vs reference: {err}"

    print("KERNEL_OK")
</pallas_src>

<mosaic_0001>
module attributes {stable_mosaic.version = 11 : i64} {
  func.func @_gat_fused_kernel(%arg0: i32, %arg1: memref<32x4xf32, #tpu.memory_space<vmem>>, %arg2: memref<16x16xf32, #tpu.memory_space<vmem>>, %arg3: memref<4x16xf32, #tpu.memory_space<vmem>>, %arg4: memref<16x4xf32, #tpu.memory_space<vmem>>, %arg5: memref<16x4xf32, #tpu.memory_space<vmem>>, %arg6: memref<4x2xf32, #tpu.memory_space<vmem>>, %arg7: memref<4x128xf32, #tpu.memory_space<vmem>>, %arg8: memref<32x128xf32, #tpu.memory_space<vmem>>) attributes {dimension_semantics = [#tpu.dimension_semantics<arbitrary>], iteration_bounds = array<i64: 1>, scalar_prefetch = 0 : i64, scratch_operands = 0 : i64, tpu.core_type = #tpu.core_type<tc>, window_params = [{pipeline_mode = #tpu.pipeline_mode<synchronous>, transform_indices = @transform_0, window_bounds = array<i64: 32, 4>}, {pipeline_mode = #tpu.pipeline_mode<synchronous>, transform_indices = @transform_1, window_bounds = array<i64: 16, 16>}, {pipeline_mode = #tpu.pipeline_mode<synchronous>, transform_indices = @transform_2, window_bounds = array<i64: 4, 16>}, {pipeline_mode = #tpu.pipeline_mode<synchronous>, transform_indices = @transform_3, window_bounds = array<i64: 16, 4>}, {pipeline_mode = #tpu.pipeline_mode<synchronous>, transform_indices = @transform_4, window_bounds = array<i64: 16, 4>}, {pipeline_mode = #tpu.pipeline_mode<synchronous>, transform_indices = @transform_5, window_bounds = array<i64: 4, 2>}, {pipeline_mode = #tpu.pipeline_mode<synchronous>, transform_indices = @transform_6, window_bounds = array<i64: 4, 128>}, {pipeline_mode = #tpu.pipeline_mode<synchronous>, transform_indices = @transform_7, window_bounds = array<i64: 32, 128>}]} {
    %c0 = arith.constant 0 : index
    %c0_0 = arith.constant 0 : index
    %0 = vector.load %arg2[%c0, %c0_0] : memref<16x16xf32, #tpu.memory_space<vmem>>, vector<16x16xf32>
    %c0_1 = arith.constant 0 : index
    %c0_2 = arith.constant 0 : index
    %1 = vector.load %arg5[%c0_1, %c0_2] : memref<16x4xf32, #tpu.memory_space<vmem>>, vector<16x4xf32>
    %c0_3 = arith.constant 0 : index
    %c0_4 = arith.constant 0 : index
    %2 = vector.load %arg6[%c0_3, %c0_4] : memref<4x2xf32, #tpu.memory_space<vmem>>, vector<4x2xf32>
    %c0_5 = arith.constant 0 : index
    %c0_6 = arith.constant 0 : index
    %3 = vector.load %arg7[%c0_5, %c0_6] : memref<4x128xf32, #tpu.memory_space<vmem>>, vector<4x128xf32>
    %c0_7 = arith.constant 0 : index
    %c0_8 = arith.constant 0 : index
    %4 = vector.load %arg1[%c0_7, %c0_8] : memref<32x4xf32, #tpu.memory_space<vmem>>, vector<32x4xf32>
    %c0_9 = arith.constant 0 : index
    %c0_10 = arith.constant 0 : index
    %5 = vector.load %arg3[%c0_9, %c0_10] : memref<4x16xf32, #tpu.memory_space<vmem>>, vector<4x16xf32>
    %cst = arith.constant dense<0.000000e+00> : vector<32x16xf32>
    %6 = tpu.matmul %4, %5, %cst {dimension_numbers = #tpu.dot_dimension_numbers<[1], [0], [0], [1], [0, 0, 1, 1], [], []>} : vector<32x4xf32>, vector<4x16xf32>, vector<32x16xf32> -> vector<32x16xf32>
    %c0_11 = arith.constant 0 : index
    %c0_12 = arith.constant 0 : index
    %7 = vector.load %arg4[%c0_11, %c0_12] : memref<16x4xf32, #tpu.memory_space<vmem>>, vector<16x4xf32>
    %cst_13 = arith.constant dense<0.000000e+00> : vector<32x4xf32>
    %8 = tpu.matmul %6, %7, %cst_13 {dimension_numbers = #tpu.dot_dimension_numbers<[1], [0], [0], [1], [0, 0, 1, 1], [], []>} : vector<32x16xf32>, vector<16x4xf32>, vector<32x4xf32> -> vector<32x4xf32>
    %9 = vector.extract_strided_slice %6 {offsets = [0, 0], sizes = [16, 16], strides = [1, 1]} : vector<32x16xf32> to vector<16x16xf32>
    %10 = vector.extract_strided_slice %8 {offsets = [0, 0], sizes = [16, 4], strides = [1, 1]} : vector<32x4xf32> to vector<16x4xf32>
    %cst_14 = arith.constant 0.000000e+00 : f32
    %11 = vector.broadcast %cst_14 : f32 to vector<16x4xf32>
    %12 = vector.extract_strided_slice %10 {offsets = [0, 0], sizes = [16, 1], strides = [1, 1]} : vector<16x4xf32> to vector<16x1xf32>
    %13 = vector.extract_strided_slice %10 {offsets = [0, 1], sizes = [16, 1], strides = [1, 1]} : vector<16x4xf32> to vector<16x1xf32>
    %14 = vector.extract_strided_slice %9 {offsets = [0, 0], sizes = [16, 8], strides = [1, 1]} : vector<16x16xf32> to vector<16x8xf32>
    %15 = tpu.transpose %13, [1, 0] : vector<16x1xf32> -> vector<1x16xf32>
    %16 = vector.broadcast %12 : vector<16x1xf32> to vector<16x16xf32>
    %17 = vector.broadcast %15 : vector<1x16xf32> to vector<16x16xf32>
    %18 = arith.addf %16, %17 : vector<16x16xf32>
    %cst_15 = arith.constant 0.000000e+00 : f32
    %19 = vector.broadcast %cst_15 : f32 to vector<16x16xf32>
    %20 = arith.cmpf ogt, %18, %19 : vector<16x16xf32>
    %cst_16 = arith.constant 2.000000e-01 : f32
    %21 = vector.broadcast %cst_16 : f32 to vector<16x16xf32>
    %22 = arith.mulf %21, %18 : vector<16x16xf32>
    %23 = arith.select %20, %18, %22 : vector<16x16xi1>, vector<16x16xf32>
    %24 = arith.addf %23, %0 : vector<16x16xf32>
    %cst_17 = arith.constant dense<0xFF800000> : vector<16xf32>
    %25 = vector.multi_reduction <maximumf>, %24, %cst_17 [1] : vector<16x16xf32> to vector<16xf32>
    %26 = vector.shape_cast %25 : vector<16xf32> to vector<16x1xf32>
    %27 = vector.broadcast %26 : vector<16x1xf32> to vector<16x16xf32>
    %28 = arith.subf %24, %27 : vector<16x16xf32>
    %29 = math.exp %28 : vector<16x16xf32>
    %cst_18 = arith.constant dense<0.000000e+00> : vector<16xf32>
    %30 = vector.multi_reduction <add>, %29, %cst_18 [1] : vector<16x16xf32> to vector<16xf32>
    %31 = vector.shape_cast %30 : vector<16xf32> to vector<16x1xf32>
    %32 = tpu.reciprocal %31 {approx = true} : vector<16x1xf32> -> vector<16x1xf32>
    %33 = vector.broadcast %32 : vector<16x1xf32> to vector<16x16xf32>
    %34 = arith.mulf %29, %33 : vector<16x16xf32>
    %cst_19 = arith.constant dense<0.000000e+00> : vector<16x8xf32>
    %35 = tpu.matmul %34, %14, %cst_19 {dimension_numbers = #tpu.dot_dimension_numbers<[1], [0], [0], [1], [0, 0, 1, 1], [], []>} : vector<16x16xf32>, vector<16x8xf32>, vector<16x8xf32> -> vector<16x8xf32>
    %cst_20 = arith.constant 0.000000e+00 : f32
    %36 = vector.broadcast %cst_20 : f32 to vector<16x8xf32>
    %37 = arith.maximumf %35, %36 : vector<16x8xf32>
    %38 = vector.extract_strided_slice %1 {offsets = [0, 0], sizes = [8, 4], strides = [1, 1]} : vector<16x4xf32> to vector<8x4xf32>
    %cst_21 = arith.constant dense<0.000000e+00> : vector<16x4xf32>
    %39 = tpu.matmul %37, %38, %cst_21 {dimension_numbers = #tpu.dot_dimension_numbers<[1], [0], [0], [1], [0, 0, 1, 1], [], []>} : vector<16x8xf32>, vector<8x4xf32>, vector<16x4xf32> -> vector<16x4xf32>
    %40 = arith.addf %11, %39 : vector<16x4xf32>
    %41 = vector.extract_strided_slice %10 {offsets = [0, 2], sizes = [16, 1], strides = [1, 1]} : vector<16x4xf32> to vector<16x1xf32>
    %42 = vector.extract_strided_slice %10 {offsets = [0, 3], sizes = [16, 1], strides = [1, 1]} : vector<16x4xf32> to vector<16x1xf32>
    %43 = vector.extract_strided_slice %9 {offsets = [0, 8], sizes = [16, 8], strides = [1, 1]} : vector<16x16xf32> to vector<16x8xf32>
    %44 = tpu.transpose %42, [1, 0] : vector<16x1xf32> -> vector<1x16xf32>
    %45 = vector.broadcast %41 : vector<16x1xf32> to vector<16x16xf32>
    %46 = vector.broadcast %44 : vector<1x16xf32> to vector<16x16xf32>
    %47 = arith.addf %45, %46 : vector<16x16xf32>
    %cst_22 = arith.constant 0.000000e+00 : f32
    %48 = vector.broadcast %cst_22 : f32 to vector<16x16xf32>
    %49 = arith.cmpf ogt, %47, %48 : vector<16x16xf32>
    %cst_23 = arith.constant 2.000000e-01 : f32
    %50 = vector.broadcast %cst_23 : f32 to vector<16x16xf32>
    %51 = arith.mulf %50, %47 : vector<16x16xf32>
    %52 = arith.select %49, %47, %51 : vector<16x16xi1>, vector<16x16xf32>
    %53 = arith.addf %52, %0 : vector<16x16xf32>
    %cst_24 = arith.constant dense<0xFF800000> : vector<16xf32>
    %54 = vector.multi_reduction <maximumf>, %53, %cst_24 [1] : vector<16x16xf32> to vector<16xf32>
    %55 = vector.shape_cast %54 : vector<16xf32> to vector<16x1xf32>
    %56 = vector.broadcast %55 : vector<16x1xf32> to vector<16x16xf32>
    %57 = arith.subf %53, %56 : vector<16x16xf32>
    %58 = math.exp %57 : vector<16x16xf32>
    %cst_25 = arith.constant dense<0.000000e+00> : vector<16xf32>
    %59 = vector.multi_reduction <add>, %58, %cst_25 [1] : vector<16x16xf32> to vector<16xf32>
    %60 = vector.shape_cast %59 : vector<16xf32> to vector<16x1xf32>
    %61 = tpu.reciprocal %60 {approx = true} : vector<16x1xf32> -> vector<16x1xf32>
    %62 = vector.broadcast %61 : vector<16x1xf32> to vector<16x16xf32>
    %63 = arith.mulf %58, %62 : vector<16x16xf32>
    %cst_26 = arith.constant dense<0.000000e+00> : vector<16x8xf32>
    %64 = tpu.matmul %63, %43, %cst_26 {dimension_numbers = #tpu.dot_dimension_numbers<[1], [0], [0], [1], [0, 0, 1, 1], [], []>} : vector<16x16xf32>, vector<16x8xf32>, vector<16x8xf32> -> vector<16x8xf32>
    %cst_27 = arith.constant 0.000000e+00 : f32
    %65 = vector.broadcast %cst_27 : f32 to vector<16x8xf32>
    %66 = arith.maximumf %64, %65 : vector<16x8xf32>
    %67 = vector.extract_strided_slice %1 {offsets = [8, 0], sizes = [8, 4], strides = [1, 1]} : vector<16x4xf32> to vector<8x4xf32>
    %cst_28 = arith.constant dense<0.000000e+00> : vector<16x4xf32>
    %68 = tpu.matmul %66, %67, %cst_28 {dimension_numbers = #tpu.dot_dimension_numbers<[1], [0], [0], [1], [0, 0, 1, 1], [], []>} : vector<16x8xf32>, vector<8x4xf32>, vector<16x4xf32> -> vector<16x4xf32>
    %69 = arith.addf %40, %68 : vector<16x4xf32>
    %cst_29 = arith.constant dense<0.000000e+00> : vector<16x2xf32>
    %70 = tpu.matmul %69, %2, %cst_29 {dimension_numbers = #tpu.dot_dimension_numbers<[1], [0], [0], [1], [0, 0, 1, 1], [], []>} : vector<16x4xf32>, vector<4x2xf32>, vector<16x2xf32> -> vector<16x2xf32>
    %71 = vector.extract_strided_slice %70 {offsets = [0, 0], sizes = [16, 1], strides = [1, 1]} : vector<16x2xf32> to vector<16x1xf32>
    %72 = vector.extract_strided_slice %70 {offsets = [0, 1], sizes = [16, 1], strides = [1, 1]} : vector<16x2xf32> to vector<16x1xf32>
    %73 = tpu.transpose %72, [1, 0] : vector<16x1xf32> -> vector<1x16xf32>
    %74 = vector.broadcast %71 : vector<16x1xf32> to vector<16x16xf32>
    %75 = vector.broadcast %73 : vector<1x16xf32> to vector<16x16xf32>
    %76 = arith.addf %74, %75 : vector<16x16xf32>
    %cst_30 = arith.constant 0.000000e+00 : f32
    %77 = vector.broadcast %cst_30 : f32 to vector<16x16xf32>
    %78 = arith.cmpf ogt, %76, %77 : vector<16x16xf32>
    %cst_31 = arith.constant 2.000000e-01 : f32
    %79 = vector.broadcast %cst_31 : f32 to vector<16x16xf32>
    %80 = arith.mulf %79, %76 : vector<16x16xf32>
    %81 = arith.select %78, %76, %80 : vector<16x16xi1>, vector<16x16xf32>
    %82 = arith.addf %81, %0 : vector<16x16xf32>
    %cst_32 = arith.constant dense<0xFF800000> : vector<16xf32>
    %83 = vector.multi_reduction <maximumf>, %82, %cst_32 [1] : vector<16x16xf32> to vector<16xf32>
    %84 = vector.shape_cast %83 : vector<16xf32> to vector<16x1xf32>
    %85 = vector.broadcast %84 : vector<16x1xf32> to vector<16x16xf32>
    %86 = arith.subf %82, %85 : vector<16x16xf32>
    %87 = math.exp %86 : vector<16x16xf32>
    %cst_33 = arith.constant dense<0.000000e+00> : vector<16xf32>
    %88 = vector.multi_reduction <add>, %87, %cst_33 [1] : vector<16x16xf32> to vector<16xf32>
    %89 = vector.shape_cast %88 : vector<16xf32> to vector<16x1xf32>
    %90 = tpu.reciprocal %89 {approx = true} : vector<16x1xf32> -> vector<16x1xf32>
    %91 = vector.broadcast %90 : vector<16x1xf32> to vector<16x16xf32>
    %92 = arith.mulf %87, %91 : vector<16x16xf32>
    %cst_34 = arith.constant dense<0.000000e+00> : vector<16x4xf32>
    %93 = tpu.matmul %92, %69, %cst_34 {dimension_numbers = #tpu.dot_dimension_numbers<[1], [0], [0], [1], [0, 0, 1, 1], [], []>} : vector<16x16xf32>, vector<16x4xf32>, vector<16x4xf32> -> vector<16x4xf32>
    %cst_35 = arith.constant 0.000000e+00 : f32
    %94 = vector.broadcast %cst_35 : f32 to vector<16x4xf32>
    %95 = arith.maximumf %93, %94 : vector<16x4xf32>
    %cst_36 = arith.constant dense<0.000000e+00> : vector<16x128xf32>
    %96 = tpu.matmul %95, %3, %cst_36 {dimension_numbers = #tpu.dot_dimension_numbers<[1], [0], [0], [1], [0, 0, 1, 1], [], []>} : vector<16x4xf32>, vector<4x128xf32>, vector<16x128xf32> -> vector<16x128xf32>
    %c0_37 = arith.constant 0 : index
    %c0_38 = arith.constant 0 : index
    %97 = vector.load %arg8[%c0_37, %c0_38] : memref<32x128xf32, #tpu.memory_space<vmem>>, vector<16x128xf32>
    tpu.vector_store %arg8[%c0_37, %c0_38], %96 {strides = array<i32>} : memref<32x128xf32, #tpu.memory_space<vmem>>, vector<16x128xf32>,
    %98 = vector.extract_strided_slice %6 {offsets = [16, 0], sizes = [16, 16], strides = [1, 1]} : vector<32x16xf32> to vector<16x16xf32>
    %99 = vector.extract_strided_slice %8 {offsets = [16, 0], sizes = [16, 4], strides = [1, 1]} : vector<32x4xf32> to vector<16x4xf32>
    %cst_39 = arith.constant 0.000000e+00 : f32
    %100 = vector.broadcast %cst_39 : f32 to vector<16x4xf32>
    %101 = vector.extract_strided_slice %99 {offsets = [0, 0], sizes = [16, 1], strides = [1, 1]} : vector<16x4xf32> to vector<16x1xf32>
    %102 = vector.extract_strided_slice %99 {offsets = [0, 1], sizes = [16, 1], strides = [1, 1]} : vector<16x4xf32> to vector<16x1xf32>
    %103 = vector.extract_strided_slice %98 {offsets = [0, 0], sizes = [16, 8], strides = [1, 1]} : vector<16x16xf32> to vector<16x8xf32>
    %104 = tpu.transpose %102, [1, 0] : vector<16x1xf32> -> vector<1x16xf32>
    %105 = vector.broadcast %101 : vector<16x1xf32> to vector<16x16xf32>
    %106 = vector.broadcast %104 : vector<1x16xf32> to vector<16x16xf32>
    %107 = arith.addf %105, %106 : vector<16x16xf32>
    %cst_40 = arith.constant 0.000000e+00 : f32
    %108 = vector.broadcast %cst_40 : f32 to vector<16x16xf32>
    %109 = arith.cmpf ogt, %107, %108 : vector<16x16xf32>
    %cst_41 = arith.constant 2.000000e-01 : f32
    %110 = vector.broadcast %cst_41 : f32 to vector<16x16xf32>
    %111 = arith.mulf %110, %107 : vector<16x16xf32>
    %112 = arith.select %109, %107, %111 : vector<16x16xi1>, vector<16x16xf32>
    %113 = arith.addf %112, %0 : vector<16x16xf32>
    %cst_42 = arith.constant dense<0xFF800000> : vector<16xf32>
    %114 = vector.multi_reduction <maximumf>, %113, %cst_42 [1] : vector<16x16xf32> to vector<16xf32>
    %115 = vector.shape_cast %114 : vector<16xf32> to vector<16x1xf32>
    %116 = vector.broadcast %115 : vector<16x1xf32> to vector<16x16xf32>
    %117 = arith.subf %113, %116 : vector<16x16xf32>
    %118 = math.exp %117 : vector<16x16xf32>
    %cst_43 = arith.constant dense<0.000000e+00> : vector<16xf32>
    %119 = vector.multi_reduction <add>, %118, %cst_43 [1] : vector<16x16xf32> to vector<16xf32>
    %120 = vector.shape_cast %119 : vector<16xf32> to vector<16x1xf32>
    %121 = tpu.reciprocal %120 {approx = true} : vector<16x1xf32> -> vector<16x1xf32>
    %122 = vector.broadcast %121 : vector<16x1xf32> to vector<16x16xf32>
    %123 = arith.mulf %118, %122 : vector<16x16xf32>
    %cst_44 = arith.constant dense<0.000000e+00> : vector<16x8xf32>
    %124 = tpu.matmul %123, %103, %cst_44 {dimension_numbers = #tpu.dot_dimension_numbers<[1], [0], [0], [1], [0, 0, 1, 1], [], []>} : vector<16x16xf32>, vector<16x8xf32>, vector<16x8xf32> -> vector<16x8xf32>
    %cst_45 = arith.constant 0.000000e+00 : f32
    %125 = vector.broadcast %cst_45 : f32 to vector<16x8xf32>
    %126 = arith.maximumf %124, %125 : vector<16x8xf32>
    %127 = vector.extract_strided_slice %1 {offsets = [0, 0], sizes = [8, 4], strides = [1, 1]} : vector<16x4xf32> to vector<8x4xf32>
    %cst_46 = arith.constant dense<0.000000e+00> : vector<16x4xf32>
    %128 = tpu.matmul %126, %127, %cst_46 {dimension_numbers = #tpu.dot_dimension_numbers<[1], [0], [0], [1], [0, 0, 1, 1], [], []>} : vector<16x8xf32>, vector<8x4xf32>, vector<16x4xf32> -> vector<16x4xf32>
    %129 = arith.addf %100, %128 : vector<16x4xf32>
    %130 = vector.extract_strided_slice %99 {offsets = [0, 2], sizes = [16, 1], strides = [1, 1]} : vector<16x4xf32> to vector<16x1xf32>
    %131 = vector.extract_strided_slice %99 {offsets = [0, 3], sizes = [16, 1], strides = [1, 1]} : vector<16x4xf32> to vector<16x1xf32>
    %132 = vector.extract_strided_slice %98 {offsets = [0, 8], sizes = [16, 8], strides = [1, 1]} : vector<16x16xf32> to vector<16x8xf32>
    %133 = tpu.transpose %131, [1, 0] : vector<16x1xf32> -> vector<1x16xf32>
    %134 = vector.broadcast %130 : vector<16x1xf32> to vector<16x16xf32>
    %135 = vector.broadcast %133 : vector<1x16xf32> to vector<16x16xf32>
    %136 = arith.addf %134, %135 : vector<16x16xf32>
    %cst_47 = arith.constant 0.000000e+00 : f32
    %137 = vector.broadcast %cst_47 : f32 to vector<16x16xf32>
    %138 = arith.cmpf ogt, %136, %137 : vector<16x16xf32>
    %cst_48 = arith.constant 2.000000e-01 : f32
    %139 = vector.broadcast %cst_48 : f32 to vector<16x16xf32>
    %140 = arith.mulf %139, %136 : vector<16x16xf32>
    %141 = arith.select %138, %136, %140 : vector<16x16xi1>, vector<16x16xf32>
    %142 = arith.addf %141, %0 : vector<16x16xf32>
    %cst_49 = arith.constant dense<0xFF800000> : vector<16xf32>
    %143 = vector.multi_reduction <maximumf>, %142, %cst_49 [1] : vector<16x16xf32> to vector<16xf32>
    %144 = vector.shape_cast %143 : vector<16xf32> to vector<16x1xf32>
    %145 = vector.broadcast %144 : vector<16x1xf32> to vector<16x16xf32>
    %146 = arith.subf %142, %145 : vector<16x16xf32>
    %147 = math.exp %146 : vector<16x16xf32>
    %cst_50 = arith.constant dense<0.000000e+00> : vector<16xf32>
    %148 = vector.multi_reduction <add>, %147, %cst_50 [1] : vector<16x16xf32> to vector<16xf32>
    %149 = vector.shape_cast %148 : vector<16xf32> to vector<16x1xf32>
    %150 = tpu.reciprocal %149 {approx = true} : vector<16x1xf32> -> vector<16x1xf32>
    %151 = vector.broadcast %150 : vector<16x1xf32> to vector<16x16xf32>
    %152 = arith.mulf %147, %151 : vector<16x16xf32>
    %cst_51 = arith.constant dense<0.000000e+00> : vector<16x8xf32>
    %153 = tpu.matmul %152, %132, %cst_51 {dimension_numbers = #tpu.dot_dimension_numbers<[1], [0], [0], [1], [0, 0, 1, 1], [], []>} : vector<16x16xf32>, vector<16x8xf32>, vector<16x8xf32> -> vector<16x8xf32>
    %cst_52 = arith.constant 0.000000e+00 : f32
    %154 = vector.broadcast %cst_52 : f32 to vector<16x8xf32>
    %155 = arith.maximumf %153, %154 : vector<16x8xf32>
    %156 = vector.extract_strided_slice %1 {offsets = [8, 0], sizes = [8, 4], strides = [1, 1]} : vector<16x4xf32> to vector<8x4xf32>
    %cst_53 = arith.constant dense<0.000000e+00> : vector<16x4xf32>
    %157 = tpu.matmul %155, %156, %cst_53 {dimension_numbers = #tpu.dot_dimension_numbers<[1], [0], [0], [1], [0, 0, 1, 1], [], []>} : vector<16x8xf32>, vector<8x4xf32>, vector<16x4xf32> -> vector<16x4xf32>
    %158 = arith.addf %129, %157 : vector<16x4xf32>
    %cst_54 = arith.constant dense<0.000000e+00> : vector<16x2xf32>
    %159 = tpu.matmul %158, %2, %cst_54 {dimension_numbers = #tpu.dot_dimension_numbers<[1], [0], [0], [1], [0, 0, 1, 1], [], []>} : vector<16x4xf32>, vector<4x2xf32>, vector<16x2xf32> -> vector<16x2xf32>
    %160 = vector.extract_strided_slice %159 {offsets = [0, 0], sizes = [16, 1], strides = [1, 1]} : vector<16x2xf32> to vector<16x1xf32>
    %161 = vector.extract_strided_slice %159 {offsets = [0, 1], sizes = [16, 1], strides = [1, 1]} : vector<16x2xf32> to vector<16x1xf32>
    %162 = tpu.transpose %161, [1, 0] : vector<16x1xf32> -> vector<1x16xf32>
    %163 = vector.broadcast %160 : vector<16x1xf32> to vector<16x16xf32>
    %164 = vector.broadcast %162 : vector<1x16xf32> to vector<16x16xf32>
    %165 = arith.addf %163, %164 : vector<16x16xf32>
    %cst_55 = arith.constant 0.000000e+00 : f32
    %166 = vector.broadcast %cst_55 : f32 to vector<16x16xf32>
    %167 = arith.cmpf ogt, %165, %166 : vector<16x16xf32>
    %cst_56 = arith.constant 2.000000e-01 : f32
    %168 = vector.broadcast %cst_56 : f32 to vector<16x16xf32>
    %169 = arith.mulf %168, %165 : vector<16x16xf32>
    %170 = arith.select %167, %165, %169 : vector<16x16xi1>, vector<16x16xf32>
    %171 = arith.addf %170, %0 : vector<16x16xf32>
    %cst_57 = arith.constant dense<0xFF800000> : vector<16xf32>
    %172 = vector.multi_reduction <maximumf>, %171, %cst_57 [1] : vector<16x16xf32> to vector<16xf32>
    %173 = vector.shape_cast %172 : vector<16xf32> to vector<16x1xf32>
    %174 = vector.broadcast %173 : vector<16x1xf32> to vector<16x16xf32>
    %175 = arith.subf %171, %174 : vector<16x16xf32>
    %176 = math.exp %175 : vector<16x16xf32>
    %cst_58 = arith.constant dense<0.000000e+00> : vector<16xf32>
    %177 = vector.multi_reduction <add>, %176, %cst_58 [1] : vector<16x16xf32> to vector<16xf32>
    %178 = vector.shape_cast %177 : vector<16xf32> to vector<16x1xf32>
    %179 = tpu.reciprocal %178 {approx = true} : vector<16x1xf32> -> vector<16x1xf32>
    %180 = vector.broadcast %179 : vector<16x1xf32> to vector<16x16xf32>
    %181 = arith.mulf %176, %180 : vector<16x16xf32>
    %cst_59 = arith.constant dense<0.000000e+00> : vector<16x4xf32>
    %182 = tpu.matmul %181, %158, %cst_59 {dimension_numbers = #tpu.dot_dimension_numbers<[1], [0], [0], [1], [0, 0, 1, 1], [], []>} : vector<16x16xf32>, vector<16x4xf32>, vector<16x4xf32> -> vector<16x4xf32>
    %cst_60 = arith.constant 0.000000e+00 : f32
    %183 = vector.broadcast %cst_60 : f32 to vector<16x4xf32>
    %184 = arith.maximumf %182, %183 : vector<16x4xf32>
    %cst_61 = arith.constant dense<0.000000e+00> : vector<16x128xf32>
    %185 = tpu.matmul %184, %3, %cst_61 {dimension_numbers = #tpu.dot_dimension_numbers<[1], [0], [0], [1], [0, 0, 1, 1], [], []>} : vector<16x4xf32>, vector<4x128xf32>, vector<16x128xf32> -> vector<16x128xf32>
    %c16 = arith.constant 16 : index
    %c0_62 = arith.constant 0 : index
    %186 = vector.load %arg8[%c16, %c0_62] : memref<32x128xf32, #tpu.memory_space<vmem>>, vector<16x128xf32>
    tpu.vector_store %arg8[%c16, %c0_62], %185 {strides = array<i32>} : memref<32x128xf32, #tpu.memory_space<vmem>>, vector<16x128xf32>,
    return
  }
  func.func @transform_0(%arg0: i32) -> (i32, i32) {
    %c0_i32 = arith.constant 0 : i32
    %c0_i32_0 = arith.constant 0 : i32
    %c0_i32_1 = arith.constant 0 : i32
    return %c0_i32, %c0_i32_0 : i32, i32
  }
  func.func @transform_1(%arg0: i32) -> (i32, i32) {
    %c0_i32 = arith.constant 0 : i32
    %c0_i32_0 = arith.constant 0 : i32
    %c0_i32_1 = arith.constant 0 : i32
    return %c0_i32, %c0_i32_0 : i32, i32
  }
  func.func @transform_2(%arg0: i32) -> (i32, i32) {
    %c0_i32 = arith.constant 0 : i32
    %c0_i32_0 = arith.constant 0 : i32
    %c0_i32_1 = arith.constant 0 : i32
    return %c0_i32, %c0_i32_0 : i32, i32
  }
  func.func @transform_3(%arg0: i32) -> (i32, i32) {
    %c0_i32 = arith.constant 0 : i32
    %c0_i32_0 = arith.constant 0 : i32
    %c0_i32_1 = arith.constant 0 : i32
    return %c0_i32, %c0_i32_0 : i32, i32
  }
  func.func @transform_4(%arg0: i32) -> (i32, i32) {
    %c0_i32 = arith.constant 0 : i32
    %c0_i32_0 = arith.constant 0 : i32
    %c0_i32_1 = arith.constant 0 : i32
    return %c0_i32, %c0_i32_0 : i32, i32
  }
  func.func @transform_5(%arg0: i32) -> (i32, i32) {
    %c0_i32 = arith.constant 0 : i32
    %c0_i32_0 = arith.constant 0 : i32
    %c0_i32_1 = arith.constant 0 : i32
    return %c0_i32, %c0_i32_0 : i32, i32
  }
  func.func @transform_6(%arg0: i32) -> (i32, i32) {
    %c0_i32 = arith.constant 0 : i32
    %c0_i32_0 = arith.constant 0 : i32
    %c0_i32_1 = arith.constant 0 : i32
    return %c0_i32, %c0_i32_0 : i32, i32
  }
  func.func @transform_7(%arg0: i32) -> (i32, i32) {
    %c0_i32 = arith.constant 0 : i32
    %c0_i32_0 = arith.constant 0 : i32
    %c0_i32_1 = arith.constant 0 : i32
    return %c0_i32, %c0_i32_0 : i32, i32
  }
}

</mosaic_0001>

<bundles_post_ra>
// kernel: gat_forward.1
= control target key start
LH: loop header
LB: loop body
LE: loop exit
PB: predicated region body
PF: predicated region fallthrough
CT: control target
= control target key end

     0   :  { %vm50_vm0 = vcmask 1043456   ;;  %vm37_vm1 = vcmask 31744   ;;  %v1172_v5 = vmov 0   ;;  %vm85_vm2 = vcmask 130048   ;;  %s1175_s10 = smov 125   ;;  %s1398_s2 = inlined_call_operand.vmem [shape: f32[4,16], index: 2, kind: input, shape index: {}]   ;;  %s1399_s0 = inlined_call_operand.vmem [shape: f32[32,4], index: 0, kind: input, shape index: {}]   ;;  %s1400_s3 = inlined_call_operand.vmem [shape: f32[16,4], index: 3, kind: input, shape index: {}]   ;;  %s1401_s1 = inlined_call_operand.vmem [shape: f32[16,16], index: 1, kind: input, shape index: {}]   ;;  %s1402_s4 = inlined_call_operand.vmem [shape: f32[16,4], index: 4, kind: input, shape index: {}]   ;;  %s1403_s5 = inlined_call_operand.vmem [shape: f32[4,2], index: 5, kind: input, shape index: {}]   ;;  %s1404_s6 = inlined_call_operand.vmem [shape: f32[4,128], index: 6, kind: input, shape index: {}]   ;;  %s1405_s7 = inlined_call_operand.vmem [shape: f32[32,128], index: 7, kind: output, shape index: {}]  }
   0x1   :  { %v36_v0 = vld [vmem:[%s1398_s2] sm:$0xf]  ;;  %v84_v2 = vld [vmem:[%s1400_s3 + $0x8] sm:$0xff]  ;;  %1104 = vset.pattern.permute.xlu2 %v1172_v5  ;;  %1106 = vset.pattern.permute.xlu0 %v1172_v5  ;;  %v1173_v8 = vmov 2   ;;  %v34_v33 = vld [vmem:[%s1399_s0 + $0x10] sm:$0xff]  ;;  %vm355_vm7 = vcmask 64512  }
   0x2   :  { %v32_v1 = vld [vmem:[%s1399_s0] sm:$0xff]  ;;  %1054 = vmatpush.msk.msra.mxu0 %vm50_vm0, %v36_v0  ;;  %112 = vmatpush.msra.mxu1 %v84_v2  ;;  %v33_v3 = vld [vmem:[%s1399_s0 + $0x8] sm:$0xff]  ;;  %v35_v38 = vld [vmem:[%s1399_s0 + $0x18] sm:$0xff]  ;;  %s1176_s0 = smov 120  }
   0x3   :  { %1055 = vmatmul.msk.f32.vlgmr.msra.gmra.mxu0 %vm37_vm1, %v32_v1  ;;  %1095 = vmatpush.msra.mxu2 %v84_v2  ;;  %v83_v4 = vld [vmem:[%s1400_s3] sm:$0xff]  ;;  %s1174_s3 = smov 127   ;;  %v1266_v29 = vld [vmem:[%s1401_s1 + $0x8] sm:$0xff] }
   0x4   :  { %113 = vmatpush.msra.mxu1 %v83_v4  ;;  %1107 = vset.pattern.permute.xlu1 %v1173_v8  ;;  %v1259_v23 = vld [vmem:[%s1401_s1] sm:$0xff] }
   0x5   :  { %1096 = vmatpush.msra.mxu2 %v83_v4 }
   0xb   :  { %1056 = vmatmul.msk.f32.gmra.mxu0 %vm37_vm1, %v33_v3 }
  0x13   :  { %1057 = vmatmul.msk.f32.gmra.mxu0 %vm37_vm1, %v34_v33 }
  0x1b   :  { %1058 = vmatmul.msk.f32.gmra.mxu0 %vm37_vm1, %v35_v38 }
  0x80   :  { %v1237_v6 = vpop.f32.mrf.mxu0 }
  0x81   :  { %1059 = vmatmul.msk.f32.vlgmr.msra.gmra.mxu1 %vm85_vm2, %v1237_v6 }
  0x88   :  { %v1241_v7 = vpop.f32.mrf.mxu0 }
  0x89   :  { %1060 = vmatmul.msk.f32.gmra.mxu1 %vm85_vm2, %v1241_v7  ;;  %228 = vmatpush.msrb.mxu2 %v1241_v7  ;;  %v1108_v47 = vpack.i.bf16 %v1237_v6, %v1241_v7 }
  0x8b   :  { %229 = vmatpush.msrb.mxu2 %v1237_v6 }
  0x90   :  { %v1286_v53 = vpop.f32.mrf.mxu0 }
  0x91   :  { %1061 = vmatmul.msk.f32.gmra.mxu1 %vm85_vm2, %v1286_v53 }
  0x98   :  { %v1290_v59 = vpop.f32.mrf.mxu0 }
  0x99   :  { %1062 = vmatmul.msk.f32.vlgmr.msra.gmra.mxu2 %vm85_vm2, %v1290_v59 }
  0xfe   :  { %v115_v9 = vpop.f32.mrf.mxu1 }
  0xff   :  { %168 = vperm.xlu2 %1104, %v115_v9   ;;  %129 = vrot.lane.b32.xlu0 %v115_v9, %s1174_s3 }
 0x106   :  { %v118_v10 = vpop.f32.mrf.mxu1 }
 0x107   :  { %1105 = vset.pattern.permute.xlu2 %v1173_v8  ;;  %239 = vrot.lane.b32.xlu0 %v115_v9, %s1175_s10 }
 0x108   :  { %131 = vrot.lane.b32.xlu1 %v118_v10, %s1174_s3  ;;  %278 = vperm.xlu2 %1105, %v115_v9  }
 0x10f   :  { %172 = vperm.xlu0 %1106, %v118_v10  }
 0x110   :  { %241 = vrot.lane.b32.xlu1 %v118_v10, %s1175_s10 }
 0x117   :  { %1115 = vset.pattern.permute.xlu0 %v1173_v8 }
 0x118   :  { %282 = vperm.xlu1 %1107, %v118_v10  }
 0x159   :  { %v169_v15 = vpop.permute.xlu2 %168 }
 0x162   :  { %v279_v16 = vpop.permute.xlu2 %278 }
 0x171   :  { %v130_v11 = vpop.permute.xlu0 %129 }
 0x172   :  { %135 = vxpose.xlu2.b32.start [1/2] (short) (narrow) %v130_v11, 8 }
 0x179   :  { %v240_v12 = vpop.permute.xlu0 %239 }
 0x17a   :  { %v132_v13 = vpop.permute.xlu1 %131  ;;  %245 = vxpose.xlu1.b32.start [1/2] (short) (narrow) %v240_v12, 8 }
 0x17b   :  { %136 = vxpose.xlu2.b32.end [2/2] (short) (narrow) %v132_v13, 8 }
 0x181   :  { %v173_v19 = vpop.permute.xlu0 %172 }
 0x182   :  { %v242_v14 = vpop.permute.xlu1 %241 }
 0x183   :  { %246 = vxpose.xlu1.b32.end [2/2] (short) (narrow) %v242_v14, 8  ;;  %v121_v14 = vpop.f32.mrf.mxu1 }
 0x18a   :  { %v283_v28 = vpop.permute.xlu1 %282 }
 0x1d6   :  { %1117 = vset.pattern.permute.xlu1 %v1172_v5 }
 0x1dd   :  { %1113 = vset.pattern.permute.xlu2 %v1172_v5 }
 0x20c   :  { %v151_v17 = vpop.trf.xlu2 }
 0x20d   :  { %v175_v18 = vperm.slane %v151_v17, 0 }
 0x20f   :  { %v176_v20 = vadd.f32 %v175_v18, %v169_v15  ;;  %v177_v21 = vadd.f32 %v175_v18, %v173_v19  ;;  %v124_v19 = vpop.f32.mrf.mxu2 }
 0x211   :  { %v180_v22 = vmul.f32 0.2, %v176_v20  ;;  %vm178_vm3 = vcmp.gt.f32.partialorder %v176_v20, 0.0  ;;  %v181_v24 = vmul.f32 0.2, %v177_v21  ;;  %vm179_vm4 = vcmp.gt.f32.partialorder %v177_v21, 0.0 }
 0x213   :  { %v182_v25 = vsel %vm178_vm3, %v176_v20, %v180_v22  ;;  %v183_v30 = vsel %vm179_vm4, %v177_v21, %v181_v24 }
 0x214   :  { %v184_v26 = vadd.f32 %v182_v25, %v1259_v23  ;;  %v185_v31 = vadd.f32 %v183_v30, %v1266_v29 }
 0x216   :  { %v186_v27 = vsel %vm85_vm2, %v184_v26, -inf  ;;  %v189_v32 = vsel %vm85_vm2, %v185_v31, -inf }
 0x217   :  { %187 = vmax.xlane.f32.xlu0 %v186_v27  ;;  %v30_v27 = vld [vmem:[%s1403_s5] sm:$0xf] }
 0x218   :  { %1071 = vmatpush.msk.msrb.mxu0 %vm50_vm0, %v30_v27 }
 0x21f   :  { %190 = vmax.xlane.f32.xlu0 %v189_v32  ;;  %v261_v34 = vpop.trf.xlu1 }
 0x220   :  { %v285_v35 = vperm.slane %v261_v34, 0 }
 0x222   :  { %v286_v36 = vadd.f32 %v285_v35, %v279_v16  ;;  %v287_v37 = vadd.f32 %v285_v35, %v283_v28 }
 0x224   :  { %v290_v39 = vmul.f32 0.2, %v286_v36  ;;  %v291_v40 = vmul.f32 0.2, %v287_v37  ;;  %vm289_vm5 = vcmp.gt.f32.partialorder %v287_v37, 0.0  ;;  %vm288_vm6 = vcmp.gt.f32.partialorder %v286_v36, 0.0 }
 0x226   :  { %v293_v41 = vsel %vm289_vm5, %v287_v37, %v291_v40  ;;  %v292_v42 = vsel %vm288_vm6, %v286_v36, %v290_v39 }
 0x227   :  { %v295_v43 = vadd.f32 %v293_v41, %v1266_v29  ;;  %v294_v44 = vadd.f32 %v292_v42, %v1259_v23 }
 0x229   :  { %v299_v45 = vsel %vm85_vm2, %v295_v43, -inf  ;;  %v296_v46 = vsel %vm85_vm2, %v294_v44, -inf }
 0x22a   :  { %300 = vmax.xlane.f32.xlu0 %v299_v45  ;;  %297 = vmax.xlane.f32.xlu2 %v296_v46 }
 0x23e   :  { %1109 = vrot.lane.b32.xlu0 %v1108_v47, %s1176_s0 }
 0x242   :  { %704 = vrot.lane.b32.xlu2 %v121_v14, %s1175_s10 }
 0x24a   :  { %633 = vperm.xlu2 %1113, %v121_v14  }
 0x252   :  { %1114 = vset.pattern.permute.xlu2 %v1173_v8  ;;  %v1310_v8 = vld [vmem:[%s1402_s4] sm:$0xff] }
 0x253   :  { %743 = vperm.xlu2 %1114, %v121_v14  }
 0x28a   :  { %v188_v48 = vpop.xlane.xlu0 %187 }
 0x28b   :  { %v192_v49 = vsub.f32 %v184_v26, %v188_v48  ;;  %v29_v26 = vld [vmem:[%s1402_s4 + $0x8] sm:$0xff] }
 0x28c   :  { %377 = vmatpush.msra.mxu2 %v29_v26 }
 0x28d   :  { %v194_v50 = vmul.f32 1.442695, %v192_v49 }
 0x28f   :  { %1124 = vpow2.f32 %v194_v50 }
 0x292   :  { %v191_v55 = vpop.xlane.xlu0 %190 }
 0x293   :  { %v193_v58 = vsub.f32 %v185_v31, %v191_v55 }
 0x295   :  { %v1125_v51 = vpop.eup %1124  ;;  %v196_v60 = vmul.f32 1.442695, %v193_v58 }
 0x296   :  { %v198_v52 = vsel %vm85_vm2, %v1125_v51, 0.0 }
 0x297   :  { %199 = vadd.xlane.f32.xlu1 %v198_v52 }
 0x29d   :  { %v298_v54 = vpop.xlane.xlu2 %297  ;;  %v301_v61 = vpop.xlane.xlu0 %300 }
 0x29e   :  { %v302_v56 = vsub.f32 %v294_v44, %v298_v54  ;;  %v303_v63 = vsub.f32 %v295_v43, %v301_v61 }
 0x2a0   :  { %v304_v57 = vmul.f32 1.442695, %v302_v56  ;;  %v306_v1 = vmul.f32 1.442695, %v303_v63 }
 0x2a2   :  { %1126 = vpow2.f32 %v304_v57 }
 0x2a3   :  { %1128 = vpow2.f32 %v196_v60 }
 0x2a4   :  { %1130 = vpow2.f32 %v306_v1 }
 0x2a5   :  { %v705_v46 = vpop.permute.xlu2 %704 }
 0x2a8   :  { %v1127_v62 = vpop.eup %1126 }
 0x2a9   :  { %v308_v0 = vsel %vm85_vm2, %v1127_v62, 0.0  ;;  %v1129_v2 = vpop.eup %1128 }
 0x2aa   :  { %309 = vadd.xlane.f32.xlu0 %v308_v0  ;;  %v201_v6 = vsel %vm85_vm2, %v1129_v2, 0.0  ;;  %v1131_v9 = vpop.eup %1130 }
 0x2ab   :  { %v311_v10 = vsel %vm85_vm2, %v1131_v9, 0.0 }
 0x2ad   :  { %v634_v50 = vpop.permute.xlu2 %633 }
 0x2b0   :  { %v1110_v3 = vpop.permute.xlu0 %1109  ;;  %594 = vrot.lane.b32.xlu1 %v121_v14, %s1174_s3 }
 0x2b1   :  { %v1111_v4 = vunpack.i.l.bf16 %v1110_v3  ;;  %v1112_v7 = vunpack.i.h.bf16 %v1110_v3 }
 0x2b2   :  { %202 = vadd.xlane.f32.xlu0 %v201_v6 }
 0x2b3   :  { %344 = vmatpush.msra.mxu3 %v1111_v4 }
 0x2b5   :  { %345 = vmatpush.msra.mxu3 %v1112_v7  ;;  %v744_v52 = vpop.permute.xlu2 %743 }
 0x2b7   :  { %406 = vmatpush.msrb.mxu3 %v1310_v8 }
 0x2ba   :  { %312 = vadd.xlane.f32.xlu0 %v311_v10 }
 0x2ce   :  { %596 = vrot.lane.b32.xlu0 %v124_v19, %s1174_s3 }
 0x2d6   :  { %706 = vrot.lane.b32.xlu0 %v124_v19, %s1175_s10 }
 0x2de   :  { %747 = vperm.xlu0 %1115, %v124_v19  }
 0x2e6   :  { %1116 = vset.pattern.permute.xlu0 %v1172_v5 }
 0x2e7   :  { %637 = vperm.xlu0 %1116, %v124_v19  }
 0x30a   :  { %v200_v11 = vpop.xlane.xlu1 %199 }
 0x30b   :  { %1132 = vrcp.f32 %v200_v11 }
 0x311   :  { %v1133_v12 = vpop.eup %1132 }
 0x312   :  { %v206_v13 = vmul.f32 %v1133_v12, %v1125_v51 }
 0x314   :  { %1063 = vmatmul.msk.f32.vlgmr.msrb.gmra.mxu2 %vm85_vm2, %v206_v13 }
 0x31d   :  { %v310_v15 = vpop.xlane.xlu0 %309 }
 0x31e   :  { %1134 = vrcp.f32 %v310_v15 }
 0x322   :  { %v595_v48 = vpop.permute.xlu1 %594 }
 0x324   :  { %v1135_v16 = vpop.eup %1134 }
 0x325   :  { %v203_v17 = vpop.xlane.xlu0 %202  ;;  %v316_v18 = vmul.f32 %v1135_v16, %v1127_v62 }
 0x326   :  { %1136 = vrcp.f32 %v203_v17 }
 0x327   :  { %1065 = vmatmul.msk.f32.vlgmr.msra.gmra.mxu3 %vm85_vm2, %v316_v18 }
 0x328   :  { %1097 = vmatpush.msk.msra.mxu3 %vm50_vm0, %v30_v27 }
 0x32c   :  { %v1137_v20 = vpop.eup %1136 }
 0x32d   :  { %v313_v21 = vpop.xlane.xlu0 %312  ;;  %v207_v22 = vmul.f32 %v1137_v20, %v1129_v2 }
 0x32e   :  { %1138 = vrcp.f32 %v313_v21 }
 0x32f   :  { %1064 = vmatmul.msk.f32.gmra.mxu2 %vm85_vm2, %v207_v22 }
 0x334   :  { %v1139_v24 = vpop.eup %1138 }
 0x335   :  { %v317_v25 = vmul.f32 %v1139_v24, %v1131_v9 }
 0x337   :  { %1066 = vmatmul.msk.f32.gmra.mxu3 %vm85_vm2, %v317_v25 }
 0x340   :  { %v597_v45 = vpop.permute.xlu0 %596 }
 0x348   :  { %v707_v47 = vpop.permute.xlu0 %706 }
 0x350   :  { %v748_v49 = vpop.permute.xlu0 %747 }
 0x359   :  { %v638_v51 = vpop.permute.xlu0 %637 }
 0x397   :  { %v231_v28 = vpop.f32.mrf.mxu2 }
 0x398   :  { %v237_v30 = vmax.f32 %v231_v28, 0.0 }
 0x39a   :  { %1069 = vmatmul.msk.f32.vlgmr.msrb.gmra.mxu3 %vm355_vm7, %v237_v30 }
 0x39b   :  { %693 = vmatpush.msrb.mxu3 %v1290_v59 }
 0x39d   :  { %694 = vmatpush.msrb.mxu3 %v1286_v53 }
 0x3aa   :  { %v347_v31 = vpop.f32.mrf.mxu3 }
 0x3ab   :  { %v353_v32 = vmax.f32 %v347_v31, 0.0 }
 0x3ad   :  { %1067 = vmatmul.msk.f32.vlgmr.msra.gmra.mxu2 %vm355_vm7, %v353_v32 }
 0x3b2   :  { %v234_v33 = vpop.f32.mrf.mxu2 }
 0x3b3   :  { %v238_v34 = vmax.f32 %v234_v33, 0.0 }
 0x3b5   :  { %1070 = vmatmul.msk.f32.gmra.mxu3 %vm355_vm7, %v238_v34 }
 0x3ba   :  { %v350_v35 = vpop.f32.mrf.mxu3 }
 0x3bb   :  { %v354_v36 = vmax.f32 %v350_v35, 0.0 }
 0x3bd   :  { %1068 = vmatmul.msk.f32.gmra.mxu2 %vm355_vm7, %v354_v36 }
 0x41d   :  { %v408_v37 = vpop.f32.mrf.mxu3 }
 0x430   :  { %v379_v38 = vpop.f32.mrf.mxu2 }
 0x431   :  { %v409_v39 = vadd.f32 %v408_v37, %v379_v38 }
 0x433   :  { %1072 = vmatmul.msk.f32.vlgmr.msrb.gmra.mxu0 %vm37_vm1, %v409_v39 }
 0x438   :  { %v411_v40 = vpop.f32.mrf.mxu3 }
 0x440   :  { %v382_v41 = vpop.f32.mrf.mxu2 }
 0x441   :  { %v412_v42 = vadd.f32 %v411_v40, %v382_v41 }
 0x443   :  { %1073 = vmatmul.msk.f32.vlgmr.msra.gmra.mxu3 %vm37_vm1, %v412_v42  ;;  %547 = vmatpush.msrb.mxu1 %v412_v42 }
 0x444   :  { %1087 = vmatpush.msk.msra.mxu3 %vm50_vm0, %v30_v27 }
 0x445   :  { %548 = vmatpush.msrb.mxu1 %v409_v39  ;;  %v1118_v39 = vpack.i.bf16 %v1286_v53, %v1290_v59 }
 0x447   :  { %841 = vmatpush.msra.mxu1 %v29_v26 }
 0x4b0   :  { %v440_v43 = vpop.f32.mrf.mxu0 }
 0x4b1   :  { %448 = vrot.lane.b32.xlu0 %v440_v43, %s1174_s3 }
 0x4b9   :  { %487 = vperm.xlu0 %1116, %v440_v43  }
 0x4c6   :  { %v443_v44 = vpop.f32.mrf.mxu3 }
 0x4c7   :  { %491 = vperm.xlu1 %1117, %v443_v44   ;;  %450 = vrot.lane.b32.xlu2 %v443_v44, %s1174_s3 }
 0x4db   :  { %710 = vxpose.xlu0.b32.start [1/2] (short) (narrow) %v705_v46, 8 }
 0x4e3   :  { %711 = vxpose.xlu0.b32.end [2/2] (short) (narrow) %v707_v47, 8 }
 0x4ed   :  { %600 = vxpose.xlu2.b32.start [1/2] (short) (narrow) %v595_v48, 8 }
 0x4f5   :  { %601 = vxpose.xlu2.b32.end [2/2] (short) (narrow) %v597_v45, 8 }
 0x521   :  { %v451_v55 = vpop.permute.xlu2 %450 }
 0x523   :  { %v449_v54 = vpop.permute.xlu0 %448 }
 0x524   :  { %454 = vxpose.xlu1.b32.start [1/2] (short) (narrow) %v449_v54, 8 }
 0x52b   :  { %v488_v0 = vpop.permute.xlu0 %487 }
 0x52c   :  { %455 = vxpose.xlu1.b32.end [2/2] (short) (narrow) %v451_v55, 8 }
 0x539   :  { %v492_v1 = vpop.permute.xlu1 %491 }
 0x557   :  { %1123 = vset.pattern.permute.xlu2 %v1172_v5 }
 0x57f   :  { %v726_v2 = vpop.trf.xlu0 }
 0x580   :  { %v750_v3 = vperm.slane %v726_v2, 0 }
 0x582   :  { %v752_v7 = vadd.f32 %v750_v3, %v748_v49  ;;  %v751_v21 = vadd.f32 %v750_v3, %v744_v52 }
 0x584   :  { %v756_v13 = vmul.f32 0.2, %v752_v7  ;;  %vm754_vm11 = vcmp.gt.f32.partialorder %v752_v7, 0.0  ;;  %v755_v27 = vmul.f32 0.2, %v751_v21  ;;  %vm753_vm13 = vcmp.gt.f32.partialorder %v751_v21, 0.0 }
 0x586   :  { %v616_v56 = vpop.trf.xlu2  ;;  %v758_v22 = vsel %vm754_vm11, %v752_v7, %v756_v13  ;;  %v757_v31 = vsel %vm753_vm13, %v751_v21, %v755_v27 }
 0x587   :  { %v640_v57 = vperm.slane %v616_v56, 0  ;;  %v760_v25 = vadd.f32 %v758_v22, %v1266_v29  ;;  %v759_v32 = vadd.f32 %v757_v31, %v1259_v23 }
 0x589   :  { %v641_v58 = vadd.f32 %v640_v57, %v634_v50  ;;  %v642_v9 = vadd.f32 %v640_v57, %v638_v51  ;;  %v764_v28 = vsel %vm85_vm2, %v760_v25, -inf  ;;  %v761_v33 = vsel %vm85_vm2, %v759_v32, -inf }
 0x58b   :  { %v645_v60 = vmul.f32 0.2, %v641_v58  ;;  %vm643_vm8 = vcmp.gt.f32.partialorder %v641_v58, 0.0  ;;  %v646_v14 = vmul.f32 0.2, %v642_v9  ;;  %vm644_vm12 = vcmp.gt.f32.partialorder %v642_v9, 0.0 }
 0x58d   :  { %v647_v61 = vsel %vm643_vm8, %v641_v58, %v645_v60  ;;  %v648_v24 = vsel %vm644_vm12, %v642_v9, %v646_v14 }
 0x58e   :  { %v649_v62 = vadd.f32 %v647_v61, %v1259_v23  ;;  %v650_v26 = vadd.f32 %v648_v24, %v1266_v29  ;;  %v31_v24 = vld [vmem:[%s1404_s6] sm:$0xf] }
 0x58f   :  { %1076 = vmatpush.msk.msrb.mxu2 %vm50_vm0, %v31_v24 }
 0x590   :  { %v651_v63 = vsel %vm85_vm2, %v649_v62, -inf  ;;  %v654_v30 = vsel %vm85_vm2, %v650_v26, -inf }
 0x591   :  { %652 = vmax.xlane.f32.xlu0 %v651_v63  ;;  %870 = vmatpush.msra.mxu2 %v1310_v8 }
 0x5c8   :  { %v470_v4 = vpop.trf.xlu1 }
 0x5c9   :  { %v494_v6 = vperm.slane %v470_v4, 0 }
 0x5cb   :  { %v495_v5 = vadd.f32 %v494_v6, %v488_v0  ;;  %v496_v10 = vadd.f32 %v494_v6, %v492_v1 }
 0x5cd   :  { %v499_v11 = vmul.f32 0.2, %v495_v5  ;;  %v500_v12 = vmul.f32 0.2, %v496_v10  ;;  %vm498_vm9 = vcmp.gt.f32.partialorder %v496_v10, 0.0  ;;  %vm497_vm10 = vcmp.gt.f32.partialorder %v495_v5, 0.0 }
 0x5cf   :  { %v502_v15 = vsel %vm498_vm9, %v496_v10, %v500_v12  ;;  %v501_v16 = vsel %vm497_vm10, %v495_v5, %v499_v11 }
 0x5d0   :  { %v504_v17 = vadd.f32 %v502_v15, %v1266_v29  ;;  %v503_v18 = vadd.f32 %v501_v16, %v1259_v23 }
 0x5d2   :  { %v508_v19 = vsel %vm85_vm2, %v504_v17, -inf  ;;  %v505_v20 = vsel %vm85_vm2, %v503_v18, -inf }
 0x5d3   :  { %509 = vmax.xlane.f32.xlu1 %v508_v19  ;;  %506 = vmax.xlane.f32.xlu2 %v505_v20 }
 0x5db   :  { %765 = vmax.xlane.f32.xlu2 %v764_v28  ;;  %655 = vmax.xlane.f32.xlu1 %v654_v30 }
 0x5e3   :  { %762 = vmax.xlane.f32.xlu1 %v761_v33 }
 0x604   :  { %v653_v34 = vpop.xlane.xlu0 %652 }
 0x605   :  { %v657_v35 = vsub.f32 %v649_v62, %v653_v34 }
 0x607   :  { %v659_v36 = vmul.f32 1.442695, %v657_v35 }
 0x609   :  { %1140 = vpow2.f32 %v659_v36 }
 0x60f   :  { %v1141_v37 = vpop.eup %1140 }
 0x610   :  { %v663_v38 = vsel %vm85_vm2, %v1141_v37, 0.0 }
 0x611   :  { %664 = vadd.xlane.f32.xlu0 %v663_v38 }
 0x625   :  { %1119 = vrot.lane.b32.xlu0 %v1118_v39, %s1176_s0 }
 0x646   :  { %v510_v40 = vpop.xlane.xlu1 %509  ;;  %v507_v41 = vpop.xlane.xlu2 %506 }
 0x647   :  { %v512_v42 = vsub.f32 %v504_v17, %v510_v40  ;;  %v511_v43 = vsub.f32 %v503_v18, %v507_v41 }
 0x649   :  { %v515_v44 = vmul.f32 1.442695, %v512_v42  ;;  %v513_v45 = vmul.f32 1.442695, %v511_v43 }
 0x64b   :  { %1142 = vpow2.f32 %v515_v44 }
 0x64c   :  { %1144 = vpow2.f32 %v513_v45 }
 0x64e   :  { %v656_v46 = vpop.xlane.xlu1 %655  ;;  %v766_v48 = vpop.xlane.xlu2 %765 }
 0x64f   :  { %v658_v47 = vsub.f32 %v650_v26, %v656_v46  ;;  %v768_v52 = vsub.f32 %v760_v25, %v766_v48 }
 0x651   :  { %v1143_v49 = vpop.eup %1142  ;;  %v661_v50 = vmul.f32 1.442695, %v658_v47  ;;  %v771_v59 = vmul.f32 1.442695, %v768_v52 }
 0x652   :  { %v1145_v51 = vpop.eup %1144  ;;  %v520_v54 = vsel %vm85_vm2, %v1143_v49, 0.0 }
 0x653   :  { %1146 = vpow2.f32 %v661_v50  ;;  %521 = vadd.xlane.f32.xlu2 %v520_v54  ;;  %v517_v53 = vsel %vm85_vm2, %v1145_v51, 0.0 }
 0x654   :  { %518 = vadd.xlane.f32.xlu1 %v517_v53  ;;  %1148 = vpow2.f32 %v771_v59 }
 0x656   :  { %v763_v55 = vpop.xlane.xlu1 %762 }
 0x657   :  { %v767_v56 = vsub.f32 %v759_v32, %v763_v55 }
 0x659   :  { %v1147_v57 = vpop.eup %1146  ;;  %v769_v58 = vmul.f32 1.442695, %v767_v56 }
 0x65a   :  { %v666_v60 = vsel %vm85_vm2, %v1147_v57, 0.0  ;;  %v1149_v61 = vpop.eup %1148 }
 0x65b   :  { %1150 = vpow2.f32 %v769_v58  ;;  %v776_v0 = vsel %vm85_vm2, %v1149_v61, 0.0 }
 0x65c   :  { %667 = vadd.xlane.f32.xlu1 %v666_v60 }
 0x661   :  { %v1151_v62 = vpop.eup %1150 }
 0x662   :  { %v773_v63 = vsel %vm85_vm2, %v1151_v62, 0.0 }
 0x663   :  { %774 = vadd.xlane.f32.xlu2 %v773_v63 }
 0x664   :  { %777 = vadd.xlane.f32.xlu1 %v776_v0 }
 0x684   :  { %v665_v1 = vpop.xlane.xlu0 %664 }
 0x685   :  { %1152 = vrcp.f32 %v665_v1 }
 0x68b   :  { %v1153_v2 = vpop.eup %1152 }
 0x68c   :  { %v671_v3 = vmul.f32 %v1153_v2, %v1141_v37 }
 0x68e   :  { %1079 = vmatmul.msk.f32.vlgmr.msrb.gmra.mxu3 %vm85_vm2, %v671_v3 }
 0x697   :  { %v1120_v4 = vpop.permute.xlu0 %1119 }
 0x698   :  { %v1121_v6 = vunpack.i.l.bf16 %v1120_v4  ;;  %v1122_v7 = vunpack.i.h.bf16 %v1120_v4 }
 0x69a   :  { %809 = vmatpush.msra.mxu0 %v1121_v6 }
 0x69c   :  { %810 = vmatpush.msra.mxu0 %v1122_v7 }
 0x6c6   :  { %v522_v5 = vpop.xlane.xlu2 %521 }
 0x6c7   :  { %v519_v9 = vpop.xlane.xlu1 %518 }
 0x6c8   :  { %1154 = vrcp.f32 %v519_v9 }
 0x6c9   :  { %1156 = vrcp.f32 %v522_v5 }
 0x6ce   :  { %v1155_v10 = vpop.eup %1154 }
 0x6cf   :  { %v668_v11 = vpop.xlane.xlu1 %667  ;;  %v525_v12 = vmul.f32 %v1155_v10, %v1145_v51  ;;  %v1157_v13 = vpop.eup %1156 }
 0x6d0   :  { %1158 = vrcp.f32 %v668_v11  ;;  %v526_v16 = vmul.f32 %v1157_v13, %v1143_v49 }
 0x6d1   :  { %1074 = vmatmul.msk.f32.vlgmr.msrb.gmra.mxu1 %vm85_vm2, %v525_v12 }
 0x6d2   :  { %1092 = vmatpush.msk.msrb.mxu1 %vm50_vm0, %v31_v24 }
 0x6d6   :  { %v1159_v14 = vpop.eup %1158  ;;  %v775_v15 = vpop.xlane.xlu2 %774 }
 0x6d7   :  { %1160 = vrcp.f32 %v775_v15  ;;  %v672_v17 = vmul.f32 %v1159_v14, %v1147_v57  ;;  %v778_v18 = vpop.xlane.xlu1 %777 }
 0x6d8   :  { %1162 = vrcp.f32 %v778_v18 }
 0x6d9   :  { %1075 = vmatmul.msk.f32.gmra.mxu1 %vm85_vm2, %v526_v16  ;;  %1080 = vmatmul.msk.f32.gmra.mxu3 %vm85_vm2, %v672_v17 }
 0x6dd   :  { %v1161_v19 = vpop.eup %1160 }
 0x6de   :  { %v781_v20 = vmul.f32 %v1161_v19, %v1151_v62  ;;  %v1163_v21 = vpop.eup %1162 }
 0x6df   :  { %v782_v22 = vmul.f32 %v1163_v21, %v1149_v61 }
 0x6e0   :  { %1081 = vmatmul.msk.f32.vlgmr.msra.gmra.mxu0 %vm85_vm2, %v781_v20 }
 0x6e8   :  { %1082 = vmatmul.msk.f32.gmra.mxu0 %vm85_vm2, %v782_v22 }
 0x711   :  { %v696_v30 = vpop.f32.mrf.mxu3 }
 0x712   :  { %v702_v33 = vmax.f32 %v696_v30, 0.0 }
 0x74e   :  { %v550_v25 = vpop.f32.mrf.mxu1 }
 0x74f   :  { %v556_v26 = vmax.f32 %v550_v25, 0.0 }
 0x751   :  { %1077 = vmatmul.msk.f32.vlgmr.msrb.gmra.mxu2 %vm37_vm1, %v556_v26 }
 0x756   :  { %v553_v27 = vpop.f32.mrf.mxu1 }
 0x757   :  { %v557_v28 = vmax.f32 %v553_v27, 0.0 }
 0x759   :  { %1078 = vmatmul.msk.f32.gmra.mxu2 %vm37_vm1, %v557_v28 }
 0x75c   :  { %v699_v34 = vpop.f32.mrf.mxu3 }
 0x75d   :  { %v812_v31 = vpop.f32.mrf.mxu0  ;;  %v703_v8 = vmax.f32 %v699_v34, 0.0 }
 0x75e   :  { %v818_v32 = vmax.f32 %v812_v31, 0.0 }
 0x760   :  { %1083 = vmatmul.msk.f32.vlgmr.msra.gmra.mxu1 %vm355_vm7, %v818_v32 }
 0x761   :  { %1085 = vmatmul.msk.f32.vlgmr.msra.gmra.mxu2 %vm355_vm7, %v702_v33 }
 0x765   :  { %v815_v35 = vpop.f32.mrf.mxu0 }
 0x766   :  { %v819_v36 = vmax.f32 %v815_v35, 0.0 }
 0x768   :  { %1084 = vmatmul.msk.f32.gmra.mxu1 %vm355_vm7, %v819_v36 }
 0x769   :  { %1086 = vmatmul.msk.f32.gmra.mxu2 %vm355_vm7, %v703_v8 }
 0x7d4   :  { %v584_v37 = vpop.f32.mrf.mxu2 }
 0x7d5   :  { %590 = vst [vmem:[%s1405_s7] sm:$0xff] %v584_v37 }
 0x7dc   :  { %v587_v38 = vpop.f32.mrf.mxu2 }
 0x7dd   :  { %591 = vst [vmem:[%s1405_s7 + $0x8] sm:$0xff] %v587_v38  ;;  %v843_v39 = vpop.f32.mrf.mxu1 }
 0x7e4   :  { %v872_v40 = vpop.f32.mrf.mxu2 }
 0x7e5   :  { %v873_v41 = vadd.f32 %v872_v40, %v843_v39  ;;  %v846_v42 = vpop.f32.mrf.mxu1 }
 0x7e7   :  { %1088 = vmatmul.msk.f32.vlgmr.msra.gmra.mxu3 %vm37_vm1, %v873_v41 }
 0x7ec   :  { %v875_v43 = vpop.f32.mrf.mxu2 }
 0x7ed   :  { %v876_v44 = vadd.f32 %v875_v43, %v846_v42 }
 0x7ef   :  { %1089 = vmatmul.msk.f32.gmra.mxu3 %vm37_vm1, %v876_v44  ;;  %1008 = vmatpush.msrb.mxu0 %v876_v44 }
 0x7f1   :  { %1009 = vmatpush.msrb.mxu0 %v873_v41 }
 0x86a   :  { %v901_v45 = vpop.f32.mrf.mxu3 }
 0x86b   :  { %948 = vperm.xlu0 %1116, %v901_v45   ;;  %909 = vrot.lane.b32.xlu2 %v901_v45, %s1174_s3 }
 0x872   :  { %v904_v46 = vpop.f32.mrf.mxu3 }
 0x873   :  { %952 = vperm.xlu2 %1123, %v904_v46   ;;  %911 = vrot.lane.b32.xlu1 %v904_v46, %s1174_s3 }
 0x8c5   :  { %v910_v47 = vpop.permute.xlu2 %909 }
 0x8c6   :  { %915 = vxpose.xlu0.b32.start [1/2] (short) (narrow) %v910_v47, 8 }
 0x8cd   :  { %v953_v52 = vpop.permute.xlu2 %952 }
 0x8dd   :  { %v949_v49 = vpop.permute.xlu0 %948 }
 0x8e5   :  { %v912_v48 = vpop.permute.xlu1 %911 }
 0x8e6   :  { %916 = vxpose.xlu0.b32.end [2/2] (short) (narrow) %v912_v48, 8 }
 0x982   :  { %v931_v50 = vpop.trf.xlu0 }
 0x983   :  { %v955_v51 = vperm.slane %v931_v50, 0 }
 0x985   :  { %v956_v54 = vadd.f32 %v955_v51, %v949_v49  ;;  %v957_v53 = vadd.f32 %v955_v51, %v953_v52 }
 0x987   :  { %v960_v59 = vmul.f32 0.2, %v956_v54  ;;  %v961_v55 = vmul.f32 0.2, %v957_v53  ;;  %vm959_vm14 = vcmp.gt.f32.partialorder %v957_v53, 0.0  ;;  %vm958_vm15 = vcmp.gt.f32.partialorder %v956_v54, 0.0 }
 0x989   :  { %v963_v56 = vsel %vm959_vm14, %v957_v53, %v961_v55  ;;  %v962_v57 = vsel %vm958_vm15, %v956_v54, %v960_v59 }
 0x98a   :  { %v965_v58 = vadd.f32 %v963_v56, %v1266_v29  ;;  %v964_v60 = vadd.f32 %v962_v57, %v1259_v23 }
 0x98c   :  { %v969_v61 = vsel %vm85_vm2, %v965_v58, -inf  ;;  %v966_v62 = vsel %vm85_vm2, %v964_v60, -inf }
 0x98d   :  { %970 = vmax.xlane.f32.xlu2 %v969_v61  ;;  %967 = vmax.xlane.f32.xlu1 %v966_v62 }
 0xa00   :  { %v971_v63 = vpop.xlane.xlu2 %970  ;;  %v968_v0 = vpop.xlane.xlu1 %967 }
 0xa01   :  { %v973_v1 = vsub.f32 %v965_v58, %v971_v63  ;;  %v972_v2 = vsub.f32 %v964_v60, %v968_v0 }
 0xa03   :  { %v976_v3 = vmul.f32 1.442695, %v973_v1  ;;  %v974_v4 = vmul.f32 1.442695, %v972_v2 }
 0xa05   :  { %1164 = vpow2.f32 %v976_v3 }
 0xa06   :  { %1166 = vpow2.f32 %v974_v4 }
 0xa0b   :  { %v1165_v6 = vpop.eup %1164 }
 0xa0c   :  { %v1167_v7 = vpop.eup %1166  ;;  %v981_v29 = vsel %vm85_vm2, %v1165_v6, 0.0 }
 0xa0d   :  { %982 = vadd.xlane.f32.xlu1 %v981_v29  ;;  %v978_v23 = vsel %vm85_vm2, %v1167_v7, 0.0 }
 0xa0e   :  { %979 = vadd.xlane.f32.xlu0 %v978_v23 }
 0xa80   :  { %v983_v5 = vpop.xlane.xlu1 %982 }
 0xa81   :  { %v980_v9 = vpop.xlane.xlu0 %979 }
 0xa82   :  { %1168 = vrcp.f32 %v980_v9 }
 0xa83   :  { %1170 = vrcp.f32 %v983_v5 }
 0xa88   :  { %v1169_v10 = vpop.eup %1168 }
 0xa89   :  { %v986_v11 = vmul.f32 %v1169_v10, %v1167_v7  ;;  %v1171_v12 = vpop.eup %1170 }
 0xa8a   :  { %v987_v13 = vmul.f32 %v1171_v12, %v1165_v6 }
 0xa8b   :  { %1090 = vmatmul.msk.f32.vlgmr.msrb.gmra.mxu0 %vm85_vm2, %v986_v11 }
 0xa93   :  { %1091 = vmatmul.msk.f32.gmra.mxu0 %vm85_vm2, %v987_v13 }
 0xb08   :  { %v1011_v14 = vpop.f32.mrf.mxu0 }
 0xb09   :  { %v1017_v15 = vmax.f32 %v1011_v14, 0.0 }
 0xb0b   :  { %1093 = vmatmul.msk.f32.vlgmr.msrb.gmra.mxu1 %vm37_vm1, %v1017_v15 }
 0xb10   :  { %v1014_v16 = vpop.f32.mrf.mxu0 }
 0xb11   :  { %v1018_v17 = vmax.f32 %v1014_v16, 0.0 }
 0xb13   :  { %1094 = vmatmul.msk.f32.gmra.mxu1 %vm37_vm1, %v1018_v17 }
 0xb88   :  { %v1042_v18 = vpop.f32.mrf.mxu1 }
 0xb89   :  { %1048 = vst [vmem:[%s1405_s7 + $0x10] sm:$0xff] %v1042_v18 }
 0xb90   :  { %v1045_v19 = vpop.f32.mrf.mxu1 }
 0xb91   :  { %1049 = vst [vmem:[%s1405_s7 + $0x18] sm:$0xff] %v1045_v19 }

</bundles_post_ra>
